<compile_context>
chip_gen: v5e
topology: v5e:2x2
jax: 0.10.0
libtpu: 0.0.40
codegen_flags: <defaults>
</compile_context>

<pallas_src>
import functools

import jax
import jax.numpy as jnp
from jax.experimental import pallas as pl
from jax.experimental.pallas import tpu as pltpu


# ------------------------- one-time parameter packing ------------------------ #

def pack_qkv_weights(w_q, w_k, w_v, inv_scale=None):
    """Pack pre-transposed nn.Linear weights into one (Din, 3*Dout) matrix.

    Done once at parameter-prep time; if the module uses scaling, 1/scale is folded
    into the W_q columns here so the hot path never multiplies by it.
    """
    wq_t = w_q.T
    if inv_scale is not None:
        wq_t = wq_t * inv_scale
    return jnp.concatenate([wq_t, w_k.T, w_v.T], axis=1)


# --------------------------- kernel 1: fused QKV ----------------------------- #

def _qkv_self_kernel(x_ref, w_ref, o_ref, *, compute_dtype):
    # Self-attention: one activation tile, one packed weight, ONE MXU dot,
    # one lane-dense (tm, 3*Dout) store.
    cd = compute_dtype
    o_ref[...] = jnp.dot(x_ref[...].astype(cd), w_ref[...].astype(cd),
                         preferred_element_type=jnp.float32).astype(o_ref.dtype)


def _qkv_cross_kernel(xq_ref, xk_ref, xv_ref, w_ref, o_ref, *, compute_dtype):
    # Distinct query/key/value activations: three MXU dots are unavoidable, but the
    # results are concatenated and written with a single lane-dense store.
    cd = compute_dtype
    outs = []
    for i, x_ref in enumerate((xq_ref, xk_ref, xv_ref)):
        outs.append(jnp.dot(x_ref[...].astype(cd), w_ref[i].astype(cd),
                            preferred_element_type=jnp.float32))
    o_ref[...] = jnp.concatenate(outs, axis=-1).astype(o_ref.dtype)


def _row_tile(m_padded):
    """Largest sublane-aligned row tile that still yields >=2 grid steps (megacore)."""
    for t in (512, 256, 128, 64, 32, 16, 8):
        if m_padded % t == 0 and m_padded // t >= 2:
            return t
    return m_padded


def _qkv_projection(xq, xk, xv, w_packed, compute_dtype, self_attention):
    """xq/xk/xv: (M, Din); w_packed: (Din, 3*O). Returns q, k, v each (M, O)."""
    M, Din = xq.shape
    O3 = w_packed.shape[1]
    O = O3 // 3
    out_dtype = jnp.dtype(compute_dtype)   # bf16 path halves intermediate HBM traffic

    # Sublane-align the row count; padded rows produce garbage that is sliced off.
    M_pad = pl.cdiv(M, 8) * 8
    if M_pad != M:
        pad = ((0, M_pad - M), (0, 0))
        xq = jnp.pad(xq, pad)
        if not self_attention:
            xk = jnp.pad(xk, pad)
            xv = jnp.pad(xv, pad)
    tm = _row_tile(M_pad)
    grid = (M_pad // tm,)

    x_spec = pl.BlockSpec((tm, Din), lambda i: (i, 0))
    o_spec = pl.BlockSpec((tm, O3), lambda i: (i, 0))
    out_shape = jax.ShapeDtypeStruct((M_pad, O3), out_dtype)
    cparams = pltpu.CompilerParams(dimension_semantics=("parallel",))

    if self_attention:
        w_spec = pl.BlockSpec((Din, O3), lambda i: (0, 0))
        qkv = pl.pallas_call(
            functools.partial(_qkv_self_kernel, compute_dtype=compute_dtype),
            out_shape=out_shape, grid=grid,
            in_specs=[x_spec, w_spec], out_specs=o_spec,
            compiler_params=cparams,
        )(xq, w_packed)
    else:
        if xk.shape[0] != xq.shape[0] or xv.shape[0] != xq.shape[0]:
            # TODO(synk): fused cross projection with different query/key row counts.
            raise NotImplementedError("fused cross projection assumes equal row counts")
        # (Din, 3O) -> (3, Din, O); tiny one-off XLA transpose, only on the cross path.
        w3 = w_packed.reshape(Din, 3, O).transpose(1, 0, 2)
        w_spec = pl.BlockSpec((3, Din, O), lambda i: (0, 0, 0))
        qkv = pl.pallas_call(
            functools.partial(_qkv_cross_kernel, compute_dtype=compute_dtype),
            out_shape=out_shape, grid=grid,
            in_specs=[x_spec, x_spec, x_spec, w_spec], out_specs=o_spec,
            compiler_params=cparams,
        )(xq, xk, xv, w3)

    if M_pad != M:
        qkv = qkv[:M]
    return qkv[:, :O], qkv[:, O:2 * O], qkv[:, 2 * O:]


# --------- kernel 2: attention + softmax + residual + ReLU (all heads) ------- #

def _mha_core_kernel(*refs, compute_dtype, use_residual, return_attention):
    q_ref, k_ref, v_ref = refs[0], refs[1], refs[2]
    idx = 3
    res_ref = None
    if use_residual:
        res_ref = refs[idx]
        idx += 1
    o_ref = refs[idx]
    a_ref = refs[idx + 1] if return_attention else None

    cd = compute_dtype
    q = q_ref[...].astype(cd)                      # (bt*H, Lq, d); 1/scale already in W_q
    k = k_ref[...].astype(cd)                      # (bt*H, Lk, d)
    v = v_ref[...].astype(cd)                      # (bt*H, Lk, d)

    # scores for all heads / grouped batches in one batched MXU pass
    s = jnp.einsum('hqd,hkd->hqk', q, k, preferred_element_type=jnp.float32)
    # TODO(synk): mask (masked_fill -inf) and attention-probability dropout.

    # softmax in f32 (torch.nn.Softmax(dim=2)); exact reciprocal (denominator is f32)
    m = jnp.max(s, axis=-1, keepdims=True)
    e = jnp.exp(s - m)
    denom = jnp.sum(e, axis=-1, keepdims=True)
    p = e * pl.reciprocal(denom, approx=False)
    if a_ref is not None:
        a_ref[...] = p.astype(a_ref.dtype)

    o = jnp.einsum('hqk,hkd->hqd', p.astype(cd), v, preferred_element_type=jnp.float32)
    if res_ref is not None:
        # residual add commutes with the raw .view since input_dim == output_dim
        o = o + res_ref[...].astype(jnp.float32)
    o_ref[...] = jnp.maximum(o, 0.0).astype(o_ref.dtype)


def _batches_per_step(B):
    """Group batches per grid step to amortize ~0.35us step overhead, keep >=2 steps."""
    if B <= 2:
        return 1
    for bt in (8, 4, 2):
        if B % bt == 0 and B // bt >= 2:
            return bt
    return 1


def _attention_core(q, k, v, res, *, num_heads, compute_dtype,
                    use_residual, return_attention):
    """q: (B*H, Lq, d), k/v: (B*H, Lk, d), res: (B*H, Lq, d) or None."""
    BH, Lq, d = q.shape
    Lk = k.shape[1]
    H = num_heads
    B = BH // H
    bt = _batches_per_step(B)
    blk = bt * H

    kernel = functools.partial(
        _mha_core_kernel, compute_dtype=compute_dtype,
        use_residual=use_residual, return_attention=return_attention)

    in_specs = [pl.BlockSpec((blk, Lq, d), lambda i: (i, 0, 0)),
                pl.BlockSpec((blk, Lk, d), lambda i: (i, 0, 0)),
                pl.BlockSpec((blk, Lk, d), lambda i: (i, 0, 0))]
    inputs = [q, k, v]
    if use_residual:
        in_specs.append(pl.BlockSpec((blk, Lq, d), lambda i: (i, 0, 0)))
        inputs.append(res)

    out_shape = [jax.ShapeDtypeStruct((BH, Lq, d), jnp.float32)]
    out_specs = [pl.BlockSpec((blk, Lq, d), lambda i: (i, 0, 0))]
    if return_attention:
        # probabilities stored in compute_dtype (bf16 halves the largest HBM write)
        out_shape.append(jax.ShapeDtypeStruct((BH, Lq, Lk), jnp.dtype(compute_dtype)))
        out_specs.append(pl.BlockSpec((blk, Lq, Lk), lambda i: (i, 0, 0)))

    outs = pl.pallas_call(
        kernel, out_shape=tuple(out_shape), grid=(B // bt,),
        in_specs=in_specs, out_specs=tuple(out_specs),
        compiler_params=pltpu.CompilerParams(dimension_semantics=("parallel",)),
    )(*inputs)

    if return_attention:
        out, attn = outs
        return out, attn
    (out,) = outs
    return out, None


# ------------------------------- forward pass -------------------------------- #

def _mha_impl(w_qkv, query, key, value, *, num_heads, attention_dim,
              use_residual, compute_dtype, return_attention, self_attention):
    B, _, input_dim = query.shape
    output_dim = num_heads * attention_dim
    if input_dim != output_dim:
        # TODO(synk): W_res (align_to='input'/'output') projection branch.
        raise NotImplementedError("input_dim != num_heads*attention_dim not supported")

    q2d = query.reshape(-1, input_dim)
    k2d = key.reshape(-1, input_dim)
    v2d = value.reshape(-1, input_dim)
    q, k, v = _qkv_projection(q2d, k2d, v2d, w_qkv, compute_dtype, self_attention)

    # raw row-major head split, identical to torch .view(B*H, -1, d)
    q = q.reshape(B * num_heads, -1, attention_dim)
    k = k.reshape(B * num_heads, -1, attention_dim)
    v = v.reshape(B * num_heads, -1, attention_dim)

    res = None
    if use_residual:
        # add the residual inside the attention kernel, in the same raw-view layout
        res = query.reshape(B * num_heads, -1, attention_dim)

    out_h, attn = _attention_core(
        q, k, v, res, num_heads=num_heads, compute_dtype=compute_dtype,
        use_residual=use_residual, return_attention=return_attention)

    output = out_h.reshape(B, -1, output_dim)      # contiguous (free) inverse raw view
    return output, attn


_mha_jit = jax.jit(
    _mha_impl,
    static_argnames=("num_heads", "attention_dim", "use_residual",
                     "compute_dtype", "return_attention", "self_attention"))


def multi_head_attention(w_qkv, query, key, value, *, num_heads, attention_dim,
                         use_residual=True, compute_dtype=jnp.float32,
                         return_attention=False):
    """MultiHeadAttention.forward (mask=None, dropout=0, layer_norm=False).

    `w_qkv` must come from pack_qkv_weights (scale already folded in when use_scale).
    """
    self_attention = (query is key) and (key is value)
    return _mha_jit(w_qkv, query, key, value,
                    num_heads=num_heads, attention_dim=attention_dim,
                    use_residual=use_residual, compute_dtype=compute_dtype,
                    return_attention=return_attention,
                    self_attention=self_attention)


# -------------------------------- reference ---------------------------------- #

def reference(params, query, key, value, *, num_heads, attention_dim,
              use_residual, use_scale):
    B = query.shape[0]
    out_dim = num_heads * attention_dim
    scale = attention_dim ** 0.5 if use_scale else None
    q = query @ params['W_q'].T
    k = key @ params['W_k'].T
    v = value @ params['W_v'].T
    q = q.reshape(B * num_heads, -1, attention_dim)
    k = k.reshape(B * num_heads, -1, attention_dim)
    v = v.reshape(B * num_heads, -1, attention_dim)
    s = jnp.einsum('bld,bmd->blm', q, k)
    if scale:
        s = s / scale
    a = jax.nn.softmax(s, axis=2)
    o = jnp.einsum('blm,bmd->bld', a, v).reshape(B, -1, out_dim)
    if use_residual:
        o = o + query
    return jnp.maximum(o, 0.0), a


# ----------------------------------- main ------------------------------------ #

if __name__ == "__main__":
    B, L, input_dim = 2, 8, 32
    num_heads, attention_dim = 2, 16          # output_dim = 32 == input_dim
    use_scale, use_residual = True, True
    output_dim = num_heads * attention_dim

    root = jax.random.PRNGKey(0)
    kx, kk, kv, kwq, kwk, kwv = jax.random.split(root, 6)
    x = jax.random.normal(kx, (B, L, input_dim), dtype=jnp.float32)
    key_in = jax.random.normal(kk, (B, L, input_dim), dtype=jnp.float32)
    value_in = jax.random.normal(kv, (B, L, input_dim), dtype=jnp.float32)
    params = {
        'W_q': 0.1 * jax.random.normal(kwq, (output_dim, input_dim), dtype=jnp.float32),
        'W_k': 0.1 * jax.random.normal(kwk, (output_dim, input_dim), dtype=jnp.float32),
        'W_v': 0.1 * jax.random.normal(kwv, (output_dim, input_dim), dtype=jnp.float32),
    }
    inv_scale = float(1.0 / (attention_dim ** 0.5)) if use_scale else None
    w_qkv = pack_qkv_weights(params['W_q'], params['W_k'], params['W_v'], inv_scale)

    cfg = dict(num_heads=num_heads, attention_dim=attention_dim,
               use_residual=use_residual)
    ref_out, ref_attn = reference(params, x, x, x, use_scale=use_scale, **cfg)

    # 1) self-attention (typical use of this module), f32 MXU path, probs requested
    out, attn = multi_head_attention(w_qkv, x, x, x, return_attention=True, **cfg)
    out = jax.block_until_ready(out)
    attn = jax.block_until_ready(attn)
    assert out.shape == (B, L, output_dim)
    assert attn.shape == (B * num_heads, L, L)
    assert jnp.allclose(out, ref_out, atol=1e-5, rtol=1e-5)
    assert jnp.allclose(attn, ref_attn, atol=1e-5, rtol=1e-5)

    # 2) distinct query / key / value, f32 MXU path
    out2, attn2 = multi_head_attention(w_qkv, x, key_in, value_in,
                                       return_attention=True, **cfg)
    out2 = jax.block_until_ready(out2)
    ref_out2, ref_attn2 = reference(params, x, key_in, value_in,
                                    use_scale=use_scale, **cfg)
    assert jnp.allclose(out2, ref_out2, atol=1e-5, rtol=1e-5)
    assert jnp.allclose(attn2, ref_attn2, atol=1e-5, rtol=1e-5)

    # 3) self-attention with bf16 MXU operands (f32 accumulation, f32 softmax)
    out3, attn3 = multi_head_attention(w_qkv, x, x, x, compute_dtype=jnp.bfloat16,
                                       return_attention=True, **cfg)
    out3 = jax.block_until_ready(out3)
    assert jnp.allclose(out3, ref_out, atol=5e-2, rtol=5e-2)
    assert jnp.allclose(attn3.astype(jnp.float32), ref_attn, atol=5e-2, rtol=5e-2)

    # 4) default fast path: no attention-probability writeback
    out4, attn4 = multi_head_attention(w_qkv, x, x, x, **cfg)
    out4 = jax.block_until_ready(out4)
    assert attn4 is None
    assert jnp.allclose(out4, ref_out, atol=1e-5, rtol=1e-5)

    print("KERNEL_OK")
</pallas_src>

<mosaic_0001>
module attributes {stable_mosaic.version = 11 : i64} {
  func.func @_qkv_self_kernel(%arg0: i32, %arg1: memref<8x32xf32, #tpu.memory_space<vmem>>, %arg2: memref<32x96xf32, #tpu.memory_space<vmem>>, %arg3: memref<8x96xf32, #tpu.memory_space<vmem>>) attributes {dimension_semantics = [#tpu.dimension_semantics<parallel>], iteration_bounds = array<i64: 2>, scalar_prefetch = 0 : i64, scratch_operands = 0 : i64, tpu.core_type = #tpu.core_type<tc>, window_params = [{transform_indices = @transform_0, window_bounds = array<i64: 8, 32>}, {pipeline_mode = #tpu.pipeline_mode<synchronous>, transform_indices = @transform_1, window_bounds = array<i64: 32, 96>}, {transform_indices = @transform_2, window_bounds = array<i64: 8, 96>}]} {
    %c0 = arith.constant 0 : index
    %c0_0 = arith.constant 0 : index
    %0 = vector.load %arg1[%c0, %c0_0] : memref<8x32xf32, #tpu.memory_space<vmem>>, vector<8x32xf32>
    %c0_1 = arith.constant 0 : index
    %c0_2 = arith.constant 0 : index
    %1 = vector.load %arg2[%c0_1, %c0_2] : memref<32x96xf32, #tpu.memory_space<vmem>>, vector<32x96xf32>
    %cst = arith.constant dense<0.000000e+00> : vector<8x96xf32>
    %2 = tpu.matmul %0, %1, %cst {dimension_numbers = #tpu.dot_dimension_numbers<[1], [0], [0], [1], [0, 0, 1, 1], [], []>} : vector<8x32xf32>, vector<32x96xf32>, vector<8x96xf32> -> vector<8x96xf32>
    %c0_3 = arith.constant 0 : index
    %c0_4 = arith.constant 0 : index
    %3 = vector.load %arg3[%c0_3, %c0_4] : memref<8x96xf32, #tpu.memory_space<vmem>>, vector<8x96xf32>
    tpu.vector_store %arg3[%c0_3, %c0_4], %2 {strides = array<i32>} : memref<8x96xf32, #tpu.memory_space<vmem>>, vector<8x96xf32>,
    return
  }
  func.func @transform_0(%arg0: i32) -> (i32, i32) {
    %c0_i32 = arith.constant 0 : i32
    %c0_i32_0 = arith.constant 0 : i32
    return %arg0, %c0_i32 : i32, i32
  }
  func.func @transform_1(%arg0: i32) -> (i32, i32) {
    %c0_i32 = arith.constant 0 : i32
    %c0_i32_0 = arith.constant 0 : i32
    %c0_i32_1 = arith.constant 0 : i32
    return %c0_i32, %c0_i32_0 : i32, i32
  }
  func.func @transform_2(%arg0: i32) -> (i32, i32) {
    %c0_i32 = arith.constant 0 : i32
    %c0_i32_0 = arith.constant 0 : i32
    return %arg0, %c0_i32 : i32, i32
  }
}

module attributes {stable_mosaic.version = 11 : i64} {
  func.func @_mha_core_kernel(%arg0: i32, %arg1: memref<2x8x16xf32, #tpu.memory_space<vmem>>, %arg2: memref<2x8x16xf32, #tpu.memory_space<vmem>>, %arg3: memref<2x8x16xf32, #tpu.memory_space<vmem>>, %arg4: memref<2x8x16xf32, #tpu.memory_space<vmem>>, %arg5: memref<2x8x16xf32, #tpu.memory_space<vmem>>, %arg6: memref<2x8x8xf32, #tpu.memory_space<vmem>>) attributes {dimension_semantics = [#tpu.dimension_semantics<parallel>], iteration_bounds = array<i64: 2>, scalar_prefetch = 0 : i64, scratch_operands = 0 : i64, tpu.core_type = #tpu.core_type<tc>, window_params = [{transform_indices = @transform_0, window_bounds = array<i64: 2, 8, 16>}, {transform_indices = @transform_1, window_bounds = array<i64: 2, 8, 16>}, {transform_indices = @transform_2, window_bounds = array<i64: 2, 8, 16>}, {transform_indices = @transform_3, window_bounds = array<i64: 2, 8, 16>}, {transform_indices = @transform_4, window_bounds = array<i64: 2, 8, 16>}, {transform_indices = @transform_5, window_bounds = array<i64: 2, 8, 8>}]} {
    %c0 = arith.constant 0 : index
    %c0_0 = arith.constant 0 : index
    %c0_1 = arith.constant 0 : index
    %0 = vector.load %arg1[%c0, %c0_0, %c0_1] : memref<2x8x16xf32, #tpu.memory_space<vmem>>, vector<2x8x16xf32>
    %c0_2 = arith.constant 0 : index
    %c0_3 = arith.constant 0 : index
    %c0_4 = arith.constant 0 : index
    %1 = vector.load %arg2[%c0_2, %c0_3, %c0_4] : memref<2x8x16xf32, #tpu.memory_space<vmem>>, vector<2x8x16xf32>
    %c0_5 = arith.constant 0 : index
    %c0_6 = arith.constant 0 : index
    %c0_7 = arith.constant 0 : index
    %2 = vector.load %arg3[%c0_5, %c0_6, %c0_7] : memref<2x8x16xf32, #tpu.memory_space<vmem>>, vector<2x8x16xf32>
    "tpu.trace_start"() <{level = 10 : i32, message = "hqd,hkd->hqk"}> : () -> ()
    %cst = arith.constant dense<0.000000e+00> : vector<2x8x8xf32>
    %3 = tpu.matmul %0, %1, %cst {dimension_numbers = #tpu.dot_dimension_numbers<[2], [2], [1], [1], [0, 0, 0, 1, 1, 1], [0], [0]>} : vector<2x8x16xf32>, vector<2x8x16xf32>, vector<2x8x8xf32> -> vector<2x8x8xf32>
    "tpu.trace_stop"() : () -> ()
    %cst_8 = arith.constant dense<0xFF800000> : vector<2x8xf32>
    %4 = vector.multi_reduction <maximumf>, %3, %cst_8 [2] : vector<2x8x8xf32> to vector<2x8xf32>
    %5 = vector.shape_cast %4 : vector<2x8xf32> to vector<2x8x1xf32>
    %6 = vector.broadcast %5 : vector<2x8x1xf32> to vector<2x8x8xf32>
    %7 = arith.subf %3, %6 : vector<2x8x8xf32>
    %8 = math.exp %7 : vector<2x8x8xf32>
    %cst_9 = arith.constant dense<0.000000e+00> : vector<2x8xf32>
    %9 = vector.multi_reduction <add>, %8, %cst_9 [2] : vector<2x8x8xf32> to vector<2x8xf32>
    %10 = vector.shape_cast %9 : vector<2x8xf32> to vector<2x8x1xf32>
    %11 = tpu.reciprocal %10 : vector<2x8x1xf32> -> vector<2x8x1xf32>
    %12 = vector.broadcast %11 : vector<2x8x1xf32> to vector<2x8x8xf32>
    %13 = arith.mulf %8, %12 : vector<2x8x8xf32>
    %c0_10 = arith.constant 0 : index
    %c0_11 = arith.constant 0 : index
    %c0_12 = arith.constant 0 : index
    %14 = vector.load %arg6[%c0_10, %c0_11, %c0_12] : memref<2x8x8xf32, #tpu.memory_space<vmem>>, vector<2x8x8xf32>
    tpu.vector_store %arg6[%c0_10, %c0_11, %c0_12], %13 {strides = array<i32>} : memref<2x8x8xf32, #tpu.memory_space<vmem>>, vector<2x8x8xf32>,
    "tpu.trace_start"() <{level = 10 : i32, message = "hqk,hkd->hqd"}> : () -> ()
    %cst_13 = arith.constant dense<0.000000e+00> : vector<2x8x16xf32>
    %15 = tpu.matmul %13, %2, %cst_13 {dimension_numbers = #tpu.dot_dimension_numbers<[2], [1], [1], [2], [0, 0, 0, 1, 1, 2], [0], [0]>} : vector<2x8x8xf32>, vector<2x8x16xf32>, vector<2x8x16xf32> -> vector<2x8x16xf32>
    "tpu.trace_stop"() : () -> ()
    %c0_14 = arith.constant 0 : index
    %c0_15 = arith.constant 0 : index
    %c0_16 = arith.constant 0 : index
    %16 = vector.load %arg4[%c0_14, %c0_15, %c0_16] : memref<2x8x16xf32, #tpu.memory_space<vmem>>, vector<2x8x16xf32>
    %17 = arith.addf %15, %16 : vector<2x8x16xf32>
    %cst_17 = arith.constant 0.000000e+00 : f32
    %18 = vector.broadcast %cst_17 : f32 to vector<2x8x16xf32>
    %19 = arith.maximumf %17, %18 : vector<2x8x16xf32>
    %c0_18 = arith.constant 0 : index
    %c0_19 = arith.constant 0 : index
    %c0_20 = arith.constant 0 : index
    %20 = vector.load %arg5[%c0_18, %c0_19, %c0_20] : memref<2x8x16xf32, #tpu.memory_space<vmem>>, vector<2x8x16xf32>
    tpu.vector_store %arg5[%c0_18, %c0_19, %c0_20], %19 {strides = array<i32>} : memref<2x8x16xf32, #tpu.memory_space<vmem>>, vector<2x8x16xf32>,
    return
  }
  func.func @transform_0(%arg0: i32) -> (i32, i32, i32) {
    %c0_i32 = arith.constant 0 : i32
    %c0_i32_0 = arith.constant 0 : i32
    %c0_i32_1 = arith.constant 0 : i32
    return %arg0, %c0_i32, %c0_i32_0 : i32, i32, i32
  }
  func.func @transform_1(%arg0: i32) -> (i32, i32, i32) {
    %c0_i32 = arith.constant 0 : i32
    %c0_i32_0 = arith.constant 0 : i32
    %c0_i32_1 = arith.constant 0 : i32
    return %arg0, %c0_i32, %c0_i32_0 : i32, i32, i32
  }
  func.func @transform_2(%arg0: i32) -> (i32, i32, i32) {
    %c0_i32 = arith.constant 0 : i32
    %c0_i32_0 = arith.constant 0 : i32
    %c0_i32_1 = arith.constant 0 : i32
    return %arg0, %c0_i32, %c0_i32_0 : i32, i32, i32
  }
  func.func @transform_3(%arg0: i32) -> (i32, i32, i32) {
    %c0_i32 = arith.constant 0 : i32
    %c0_i32_0 = arith.constant 0 : i32
    %c0_i32_1 = arith.constant 0 : i32
    return %arg0, %c0_i32, %c0_i32_0 : i32, i32, i32
  }
  func.func @transform_4(%arg0: i32) -> (i32, i32, i32) {
    %c0_i32 = arith.constant 0 : i32
    %c0_i32_0 = arith.constant 0 : i32
    %c0_i32_1 = arith.constant 0 : i32
    return %arg0, %c0_i32, %c0_i32_0 : i32, i32, i32
  }
  func.func @transform_5(%arg0: i32) -> (i32, i32, i32) {
    %c0_i32 = arith.constant 0 : i32
    %c0_i32_0 = arith.constant 0 : i32
    %c0_i32_1 = arith.constant 0 : i32
    return %arg0, %c0_i32, %c0_i32_0 : i32, i32, i32
  }
}

</mosaic_0001>

<bundles_post_ra>
// kernel: _mha_impl.2
= control target key start
LH: loop header
LB: loop body
LE: loop exit
PB: predicated region body
PF: predicated region fallthrough
CT: control target
= control target key end

     0   :  { %7 = vsyncpa [#allocation3], 0  ;;  %s570_s0 = inlined_call_operand.hbm [shape: f32[16,32], index: 0, kind: input, shape index: {}]   ;;  %s571_s1 = inlined_call_operand.hbm [shape: f32[32,96], index: 1, kind: input, shape index: {}]   ;;  %s572_s2 = inlined_call_operand.vmem [shape: f32[16,96], index: 2, kind: output, shape index: {}]  }
   0x1   :  { %9 = vsyncpa [#allocation3 + $0x1], 0 }
   0x2   :  { %10 = vsyncpa [#allocation5], 0  ;;  %s467_s9 = smov 0   ;;  %s469_s10 = smov 0  }
   0x3   :  { %s471_s11 = smov 0   ;;  %s473_s12 = smov 0  }
   0x4 LB: > { %s105_s15 = sshll.u32 %s571_s1, 4  ;;  %s489_s16 = sadd.s32 4294967295, %s447_s12   ;;  %s447_s12 = sphi %s473_s12, %s579_s12   ;;  %s443_s11 = sphi %s471_s11, %s578_s11   ;;  %s439_s10 = sphi %s469_s10, %s577_s10   ;;  %s435_s9 = sphi %s467_s9, %s576_s9   ;;  %s106_s15 = int_to_ptr.hbm [resolvable:$true] %s105_s15 }
   0x5   : > { %p285_p0 = scmp.ge.s32.totalorder %s447_s12, 1  ;;  %p37_p1 = scmp.eq.s32.totalorder %s489_s16, 0 }
   0x6   : > { %p94_p2 = scmp.lt.s32.totalorder %s447_s12, 3  ;;  %s449_s18 = smov [#allocation4]  }
   0x7   : > { %s107_s19 = sshll.u32 %s449_s18, 4  ;;  %s450_s20 = smov 128   ;;  %s108_s19 = int_to_ptr.vmem [resolvable:$true] %s107_s19 }
   0x8   : > { %p494_p3 = pnand %p285_p0, %p94_p2  ;;  %s451_s21 = smov 8  }
   0x9   : > { %s503_s22 = sadd.s32 1, %s447_s12   ;;  %s23_s24 = sadd.s32 1, %s443_s11 }
   0xa   : > { %p303_p4 = pneg %p494_p3  ;;  %s20_s23 = ssub.s32 %s447_s12, %s503_s22 }
   0xb   : > { %p21_p6 = scmp.eq.s32.totalorder %s20_s23, 0  ;;  %p30_p7 = scmp.ne.s32.totalorder %s443_s11, %s439_s10 }
   0xc   : > { %p304_p5 = pnand %p303_p4, %p37_p1  ;;  %p31_p8 = scmp.eq.s32.totalorder %s447_s12, 0 }
   0xd   : > { %p36_p9 = scmp.ne.s32.totalorder %s439_s10, %s435_s9  ;;  %p312_p12 = scmp.lt.s32.totalorder %s447_s12, 2 }
   0xe   : > { %306 = dma.hbm_to_vmem [thread:$0]  (!%p304_p5), %s106_s15, 512, %s108_s19, [#allocation5], %s450_s20, %s450_s20, %s451_s21  }
   0xf   : > { %s513_s25 = scalar_select %p21_p6, %s443_s11, %s23_s24  }
  0x10   : > { %p32_p10 = por %p31_p8, %p30_p7  ;;  %p517_p11 = por %p37_p1, %p36_p9 }
  0x11   : > { %s121_s27 = sand.u32 1, %s443_s11   ;;  %s289_s29 = sshll.u32 %s447_s12, 3 }
  0x12   : > { %s288_s28 = sshll.u32 %s121_s27, 3  ;;  %s129_s4 = scalar_lea.hbm %s570_s0, %s289_s29 }
  0x13   : > { %s125_s5 = scalar_lea.vmem [#allocation2], %s288_s28  ;;  %s131_s7 = sshll.u32 %s129_s4, 4  ;;  %s132_s7 = int_to_ptr.hbm [resolvable:$true] %s131_s7 }
  0x14   : > { %s133_s6 = sshll.u32 %s125_s5, 4  ;;  %p527_p13 = pnand %p312_p12, %p32_p10  ;;  %s134_s6 = int_to_ptr.vmem [resolvable:$true] %s133_s6 }
  0x15   : > { %s122_s9 = scalar_lea.sflag [#allocation3], %s121_s27  ;;  %s379_s13 = sshra.s32 %s132_s7, 4  ;;  %s380_s13 = int_to_ptr.hbm [resolvable:$true] %s379_s13 }
  0x16   : > { %s381_s14 = scalar_lea.hbm %s380_s13, 8  ;;  %p383_p2 = pneg %p527_p13 }
  0x17   : > { %p382_p0 = scmp.ne.s32.totalorder %s380_s13, %s381_s14  ;;  %s386_s18 = scalar_lea.hbm %s570_s0, 16 }
  0x18   : > { %p387_p6 = scmp.lt.s32.totalorder %s380_s13, %s570_s0  ;;  %p388_p7 = scmp.lt.s32.totalorder %s386_s18, %s381_s14 }
  0x19   : > { %p384_p4 = pnand %p383_p2, %p382_p0 }
  0x1a   : > { %p389_p8 = por %p388_p7, %p387_p6 }
  0x1b   : > { %p385_p5 = pneg %p384_p4 }
  0x1d   : > { %p390_p9 = pnand %p389_p8, %p385_p5 }
  0x1f   : > { %393 = shalt.err (!%p390_p9)
}
  0x20   : > { %310 = dma.hbm_to_vmem [thread:$0]  (!%p527_p13), %s132_s7, 128, %s134_s6, %s122_s9  }
  0x21   : > { %142 = sbr.rel (%p494_p3) target bundleno = 176 (0xb0), region = 28  ;;  %s144_s21 = sand.u32 (!%p494_p3), 1, %s439_s10  }
  0x22   : > { %s291_s23 = sshll.u32 (!%p494_p3), %s144_s21, 3  ;;  %s145_s24 = scalar_lea.sflag (!%p494_p3), [#allocation3], %s144_s21 }
  0x23   : > { %s148_s27 = scalar_lea.vmem (!%p494_p3), [#allocation2], %s291_s23 }
  0x26   : > { %426 = dma.done.wait (%p517_p11), %s145_s24, 128  }
  0x27   : > { %428 = vsyncadd (%p517_p11), %s145_s24, 4294967168 }
  0x28   : > { %430 = dma.done.wait (%p37_p1), [#allocation5], 512  }
  0x29   : > { %432 = vsyncadd (%p37_p1), [#allocation5], 4294966784  ;;  %v182_v0 = vld [vmem:[#allocation4 + $0x18] sm:$0xff]  ;;  %v181_v1 = vld [vmem:[#allocation4 + $0x10] sm:$0xff]  ;;  %vm183_vm0 = vcmask 261120   ;;  %p174_p3 = scmp.lt.s32.totalorder %s489_s16, 1 }
  0x2a   : > { %199 = vmatpush.msra.mxu0 %v182_v0  ;;  %v180_v2 = vld [vmem:[#allocation4 + $0x8] sm:$0xff]  ;;  %v179_v3 = vld [vmem:[#allocation4] sm:$0xff]  ;;  %v178_v4 = vld [vmem:[%s148_s27] sm:$0xff]  ;;  %vm207_vm1 = vcmask 785408  }
  0x2b   : > { %s581_s16 = smov (!%p174_p3, %s489_s16), 1 }
  0x2c   : > { %200 = vmatpush.msra.mxu0 %v181_v1  ;;  %s293_s17 = sshll.u32 %s581_s16, 3 }
  0x2d   : > { %s177_s29 = scalar_lea.vmem %s572_s2, %s293_s17 }
  0x2e   : > { %201 = vmatpush.msra.mxu0 %v180_v2 }
  0x30   : > { %202 = vmatpush.msra.mxu0 %v179_v3 }
  0x31   : > { %294 = vmatmul.msk.f32.vlgmr.msra.gmra.mxu0 %vm183_vm0, %v178_v4 }
  0xae   : > { %v204_v5 = vpop.f32.mrf.mxu0 }
  0xaf   : > { %208 = vst.msk [vmem:[%s177_s29] sm:$0xff] %vm207_vm1, %v204_v5 }
  0xb0 PF: > { %p13_p1 = scmp.ge.s32.totalorder %s503_s22, 4   ;;  %s576_s9 = smov %s439_s10 }
  0xb1   : > { %s577_s10 = smov %s443_s11  ;;  %s578_s11 = smov %s513_s25 }
  0xb2   : > { %s579_s12 = smov %s503_s22  ;;  %15 = sbr.rel (!%p13_p1) target bundleno = 4 (0x4), region = 72 }
  0xb7   :  { %228 = vsyncpa [#allocation3], 1 }
  0xb8   :  { %230 = vsyncpa [#allocation3 + $0x1], 1 }
  0xb9   :  { %231 = vsyncpa [#allocation5], 1 }

// kernel: _mha_impl.3
= control target key start
LH: loop header
LB: loop body
LE: loop exit
PB: predicated region body
PF: predicated region fallthrough
CT: control target
= control target key end

     0   :  { %11 = vsyncpa [#allocation3], 0  ;;  %s909_s0 = inlined_call_operand.vmem [shape: f32[4,8,16], index: 0, kind: input, shape index: {}]   ;;  %s910_s1 = inlined_call_operand.vmem [shape: f32[4,8,16], index: 1, kind: input, shape index: {}]   ;;  %s911_s2 = inlined_call_operand.vmem [shape: f32[4,8,16], index: 2, kind: input, shape index: {}]   ;;  %s912_s3 = inlined_call_operand.vmem [shape: f32[4,8,16], index: 3, kind: input, shape index: {}]   ;;  %s913_s4 = inlined_call_operand.vmem [shape: f32[4,8,16], index: 4, kind: output, shape index: {0}]   ;;  %s914_s5 = inlined_call_operand.hbm [shape: f32[4,8,8], index: 5, kind: output, shape index: {1}]  }
   0x1   :  { %13 = vsyncpa [#allocation3 + $0x1], 0  ;;  %s788_s18 = smov 0   ;;  %s790_s19 = smov 0  }
   0x2   :  { %s792_s20 = smov 0   ;;  %s794_s21 = smov 0  }
   0x3 LB: > { %s809_s22 = sadd.s32 4294967295, %s754_s21   ;;  %s616_s23 = sadd.s32 4294967294, %s754_s21   ;;  %s754_s21 = sphi %s794_s21, %s920_s21   ;;  %s750_s20 = sphi %s792_s20, %s919_s20   ;;  %s746_s19 = sphi %s790_s19, %s918_s19   ;;  %s742_s18 = sphi %s788_s18, %s917_s18  }
   0x4   : > { %s813_s24 = sadd.s32 1, %s754_s21   ;;  %s156_s25 = sadd.s32 1, %s750_s20 }
   0x5   : > { %s153_s26 = ssub.s32 %s754_s21, %s813_s24  ;;  %p166_p0 = scmp.ne.s32.totalorder %s750_s20, %s746_s19 }
   0x6   : > { %p154_p1 = scmp.eq.s32.totalorder %s153_s26, 0  ;;  %p167_p2 = scmp.eq.s32.totalorder %s809_s22, 1 }
   0x7   : > { %p172_p3 = scmp.ne.s32.totalorder %s746_s19, %s742_s18  ;;  %p173_p4 = scmp.eq.s32.totalorder %s616_s23, 1 }
   0x8   : > { %s824_s27 = scalar_select %p154_p1, %s750_s20, %s156_s25  }
   0x9   : > { %p826_p5 = por %p167_p2, %p166_p0  ;;  %p830_p6 = por %p173_p4, %p172_p3 }
   0xa   : > { %p619_p7 = scmp.ge.s32.totalorder %s754_s21, 1  ;;  %p227_p8 = scmp.lt.s32.totalorder %s754_s21, 3 }
   0xc   : > { %p228_p9 = pnand %p619_p7, %p227_p8 }
   0xd   : > { %s621_s30 = sshll.u32 (!%p228_p9), %s809_s22, 1  ;;  %s272_s16 = sand.u32 (!%p228_p9), 1, %s746_s19  }
   0xe   : > { %231 = sbr.rel (%p228_p9) target bundleno = 561 (0x231), region = 36  ;;  %p276_p10 = scmp.lt.s32.totalorder (!%p228_p9), %s621_s30, 3 }
   0xf   : > { %s620_s17 = sshll.u32 (!%p228_p9), %s272_s16, 4  ;;  %s642_s25 = sshll.u32 (!%p228_p9), %s809_s22, 4 }
  0x10   : > { %s274_s23 = scalar_lea.vmem (!%p228_p9), [#allocation2], %s620_s17  ;;  %s489_s7 = scalar_lea.hbm (!%p228_p9), %s914_s5, %s642_s25 }
  0x11   : > { %s490_s8 = sshll.u32 (!%p228_p9), %s274_s23, 4  ;;  %s474_s10 = scalar_lea.sflag (!%p228_p9), [#allocation3], %s272_s16  ;;  %s491_s8 = int_to_ptr.vmem [resolvable:$true] %s490_s8 }
  0x12   : > { %s712_s22 = scalar_lea.hbm (!%p228_p9), %s914_s5, 32 }
  0x13   : > { %s922_s30 = smov (!%p276_p10, %s621_s30), 3  ;;  %vm312_vm0 = vcmask 130048   ;;  %vm365_vm1 = vcmask 64512  }
  0x14   : > { %s837_s6 = sshll.u32 %s922_s30, 3 }
  0x15   : > { %s285_s9 = scalar_lea.vmem %s910_s1, %s837_s6  ;;  %s279_s12 = scalar_lea.vmem %s909_s0, %s837_s6 }
  0x16   : > { %v308_v0 = vld [vmem:[%s285_s9] sm:$0xff]  ;;  %v309_v1 = vld [vmem:[%s285_s9 + $0x8] sm:$0xff]  ;;  %s291_s15 = scalar_lea.vmem %s911_s2, %s837_s6  ;;  %s492_s9 = sshll.u32 %s489_s7, 4  ;;  %s493_s9 = int_to_ptr.hbm [resolvable:$true] %s492_s9 }
  0x17   : > { %631 = vmatpush.xpose.msk.msra.mxu0 %vm312_vm0, %v308_v0  ;;  %v306_v2 = vld [vmem:[%s279_s12] sm:$0xff]  ;;  %633 = vmatpush.xpose.msk.msra.mxu1 %vm312_vm0, %v309_v1  ;;  %v307_v3 = vld [vmem:[%s279_s12 + $0x8] sm:$0xff]  ;;  %s706_s11 = sshra.s32 %s493_s9, 4  ;;  %s707_s11 = int_to_ptr.hbm [resolvable:$true] %s706_s11 }
  0x18   : > { %v310_v18 = vld [vmem:[%s291_s15] sm:$0xff]  ;;  %v311_v19 = vld [vmem:[%s291_s15 + $0x8] sm:$0xff]  ;;  %s708_s12 = scalar_lea.hbm %s707_s11, 16  ;;  %p713_p0 = scmp.lt.s32.totalorder %s707_s11, %s914_s5 }
  0x19   : > { %436 = vmatpush.msra.mxu2 %v310_v18  ;;  %459 = vmatpush.msra.mxu3 %v311_v19  ;;  %p709_p11 = scmp.ne.s32.totalorder %s707_s11, %s708_s12  ;;  %p714_p1 = scmp.lt.s32.totalorder %s712_s22, %s708_s12 }
  0x1a   : > { %632 = vmatmul.msk.f32.vlgmr.msra.gmra.mxu0 %vm312_vm0, %v306_v2  ;;  %634 = vmatmul.msk.f32.vlgmr.msra.gmra.mxu1 %vm312_vm0, %v307_v3 }
  0x1b   : > { %p710_p12 = pnand %p709_p11, %p826_p5  ;;  %p715_p2 = por %p714_p1, %p713_p0 }
  0x1d   : > { %p711_p13 = pneg %p710_p12 }
  0x1f   : > { %p716_p3 = pnand %p715_p2, %p711_p13 }
  0x97   : > { %v336_v4 = vpop.f32.mrf.mxu0  ;;  %v362_v6 = vpop.f32.mrf.mxu1 }
  0x98   : > { %v366_v5 = vsel %vm365_vm1, %v336_v4, -inf  ;;  %v369_v7 = vsel %vm365_vm1, %v362_v6, -inf }
  0x99   : > { %367 = vmax.xlane.f32.xlu0 %v366_v5 }
  0xa1   : > { %370 = vmax.xlane.f32.xlu0 %v369_v7 }
 0x10c   : > { %v368_v8 = vpop.xlane.xlu0 %367 }
 0x10d   : > { %v372_v9 = vsub.f32 %v336_v4, %v368_v8 }
 0x10f   : > { %v374_v10 = vmul.f32 1.442695, %v372_v9 }
 0x111   : > { %684 = vpow2.f32 %v374_v10 }
 0x114   : > { %v371_v11 = vpop.xlane.xlu0 %370 }
 0x115   : > { %v373_v12 = vsub.f32 %v362_v6, %v371_v11 }
 0x117   : > { %v685_v13 = vpop.eup %684  ;;  %v376_v14 = vmul.f32 1.442695, %v373_v12 }
 0x118   : > { %v378_v15 = vsel %vm365_vm1, %v685_v13, 0.0 }
 0x119   : > { %686 = vpow2.f32 %v376_v14  ;;  %379 = vadd.xlane.f32.xlu1 %v378_v15 }
 0x11f   : > { %v687_v16 = vpop.eup %686 }
 0x120   : > { %v381_v17 = vsel %vm365_vm1, %v687_v16, 0.0 }
 0x121   : > { %382 = vadd.xlane.f32.xlu1 %v381_v17 }
 0x18c   : > { %v380_v20 = vpop.xlane.xlu1 %379 }
 0x18d   : > { %688 = vrcp.f32 %v380_v20  ;;  %v395_v25 = vand.u32 2147483648, %v380_v20  ;;  %v393_v27 = vand.u32 2147483647, %v380_v20  ;;  %vm389_vm3 = vweird.f32 %v380_v20 }
 0x18f   : > { %v396_v30 = vor.u32 1.1754944e-38, %v395_v25  ;;  %vm394_vm5 = vcmp.eq.f32.partialorder %v393_v27, 8.507059e+37 }
 0x193   : > { %v689_v21 = vpop.eup %688 }
 0x194   : > { %v385_v22 = vmul.f32 %v689_v21, %v380_v20  ;;  %v383_v23 = vpop.xlane.xlu1 %382  ;;  %vm390_vm2 = vweird.f32 %v689_v21 }
 0x195   : > { %690 = vrcp.f32 %v383_v23  ;;  %vm391_vm4 = vmor %vm389_vm3, %vm390_vm2  ;;  %v409_v36 = vand.u32 2147483648, %v383_v23  ;;  %v407_v38 = vand.u32 2147483647, %v383_v23  ;;  %vm403_vm7 = vweird.f32 %v383_v23 }
 0x196   : > { %v386_v24 = vsub.f32 1.0, %v385_v22 }
 0x197   : > { %v410_v40 = vor.u32 1.1754944e-38, %v409_v36  ;;  %vm408_vm9 = vcmp.eq.f32.partialorder %v407_v38, 8.507059e+37 }
 0x198   : > { %v387_v26 = vmul.f32 %v689_v21, %v386_v24 }
 0x19a   : > { %v388_v28 = vadd.f32 %v689_v21, %v387_v26 }
 0x19b   : > { %v691_v29 = vpop.eup %690 }
 0x19c   : > { %v399_v31 = vmul.f32 %v691_v29, %v383_v23  ;;  %v392_v32 = vsel %vm391_vm4, %v689_v21, %v388_v28  ;;  %vm404_vm6 = vweird.f32 %v691_v29 }
 0x19d   : > { %v397_v33 = vsel %vm394_vm5, %v396_v30, %v392_v32  ;;  %vm405_vm8 = vmor %vm403_vm7, %vm404_vm6 }
 0x19e   : > { %v400_v34 = vsub.f32 1.0, %v399_v31  ;;  %v412_v35 = vmul.f32 %v685_v13, %v397_v33 }
 0x1a0   : > { %v401_v37 = vmul.f32 %v691_v29, %v400_v34  ;;  %414 = vst.msk [vmem:[%s274_s23] sm:$0xff] %vm365_vm1, %v412_v35  ;;  %635 = vmatmul.msk.f32.vlgmr.msra.gmra.mxu2 %vm365_vm1, %v412_v35 }
 0x1a2   : > { %v402_v39 = vadd.f32 %v691_v29, %v401_v37 }
 0x1a4   : > { %v406_v41 = vsel %vm405_vm8, %v691_v29, %v402_v39 }
 0x1a5   : > { %v411_v42 = vsel %vm408_vm9, %v410_v40, %v406_v41 }
 0x1a6   : > { %v413_v43 = vmul.f32 %v687_v16, %v411_v42 }
 0x1a8   : > { %415 = vst.msk [vmem:[%s274_s23 + $0x8] sm:$0xff] %vm365_vm1, %v413_v43  ;;  %636 = vmatmul.msk.f32.vlgmr.msra.gmra.mxu3 %vm365_vm1, %v413_v43 }
 0x1a9   : > { %719 = shalt.err (!%p716_p3)
}
 0x1aa   : > { %s756_s16 = smov 128   ;;  %s757_s23 = smov 8  }
 0x1ab   : > { %643 = dma.vmem_to_hbm [thread:$0]  (%p826_p5), %s491_s8, 256, %s493_s9, %s474_s10, %s756_s16, %s756_s16, %s757_s23  }
 0x1ac   : > { %s297_s30 = scalar_lea.vmem %s912_s3, %s837_s6  ;;  %s303_s12 = scalar_lea.vmem %s913_s4, %s837_s6 }
 0x1ad   : > { %v416_v44 = vld [vmem:[%s297_s30] sm:$0xff]  ;;  %v417_v48 = vld [vmem:[%s297_s30 + $0x8] sm:$0xff] }
 0x223   : > { %v438_v45 = vpop.f32.mrf.mxu2 }
 0x224   : > { %v439_v46 = vadd.f32 %v438_v45, %v416_v44 }
 0x226   : > { %v464_v47 = vmax.f32 %v439_v46, 0.0 }
 0x228   : > { %466 = vst.msk [vmem:[%s303_s12] sm:$0xff] %vm312_vm0, %v464_v47 }
 0x22b   : > { %v461_v49 = vpop.f32.mrf.mxu3 }
 0x22c   : > { %v462_v50 = vadd.f32 %v461_v49, %v417_v48 }
 0x22e   : > { %v465_v51 = vmax.f32 %v462_v50, 0.0 }
 0x230   : > { %467 = vst.msk [vmem:[%s303_s12 + $0x8] sm:$0xff] %vm312_vm0, %v465_v51 }
 0x231 PF: > { %p649_p4 = scmp.ge.s32.totalorder %s754_s21, 2  ;;  %s515_s28 = sand.u32 1, %s742_s18  }
 0x232   : > { %s516_s8 = scalar_lea.sflag [#allocation3], %s515_s28 }
 0x233   : > { %p646_p5 = pnand %p649_p4, %p830_p6 }
 0x235   : > { %p647_p7 = pneg %p646_p5 }
 0x237   : > { %737 = dma.done.wait (%p647_p7), %s516_s8, 256  }
 0x238   : > { %739 = vsyncadd (%p647_p7), %s516_s8, 4294967040  ;;  %p16_p8 = scmp.ge.s32.totalorder %s813_s24, 4   ;;  %s917_s18 = smov %s746_s19 }
 0x239   : > { %s918_s19 = smov %s750_s20  ;;  %s919_s20 = smov %s824_s27 }
 0x23a   : > { %s920_s21 = smov %s813_s24  ;;  %18 = sbr.rel (!%p16_p8) target bundleno = 3 (0x3), region = 92 }
 0x23f   :  { %522 = vsyncpa [#allocation3], 1 }
 0x240   :  { %524 = vsyncpa [#allocation3 + $0x1], 1 }

</bundles_post_ra>
